<compile_context>
chip_gen: v7x
topology: tpu7x:2x2x1
jax: 0.10.0
libtpu: 0.0.40
codegen_flags: <defaults>
</compile_context>

<pallas_src>
import math
from functools import partial

import jax
import jax.numpy as jnp
from jax import lax
from jax.experimental import pallas as pl
from jax.experimental.pallas import tpu as pltpu

_NEG_LARGE = -1e30  # finite "masked" fill: keeps fully-masked rows NaN-free


def _round_up(x, m):
    return ((x + m - 1) // m) * m


def _vmem_capacity_bytes():
    """Per-core VMEM capacity; conservative 64 MiB (v7x) fallback."""
    try:
        info = pltpu.get_tpu_info()
        cap = getattr(info, "vmem_capacity_bytes", None)
        if cap:
            return int(cap)
    except Exception:
        pass
    return 64 * 1024 * 1024


def _estimate_vmem_bytes(tq, lk_pad, d, dv, itemsize, has_mask):
    """Rough per-step VMEM use for the chosen tiling."""
    b = 0
    b += 2 * tq * d * itemsize            # q tile (double-buffered)
    b += 2 * tq * dv * itemsize           # out tile
    b += 2 * tq * lk_pad * itemsize       # attn tile
    if has_mask:
        b += 2 * tq * lk_pad              # int8 mask tile
    b += 1 * lk_pad * d * itemsize        # K (single-buffered, resident per batch)
    b += 1 * lk_pad * dv * itemsize       # V (single-buffered, resident per batch)
    b += 3 * tq * lk_pad * 4              # f32 softmax temps (s, e, p)
    return b


def _select_tq(Lq, lk_pad, d, dv, itemsize, has_mask, batch, tq_target, budget):
    cap = _round_up(min(tq_target, _round_up(Lq, 32)), 32)
    if batch == 1 and Lq > 32:
        # Guarantee >= 2 q tiles so both TensorCores (v7x megacore) have work.
        cap = min(cap, _round_up((Lq + 1) // 2, 32))
    tq = max(32, cap)
    while tq > 32 and _estimate_vmem_bytes(tq, lk_pad, d, dv, itemsize, has_mask) > budget:
        tq -= 32
    return tq


def _sdpa_kernel(*refs, inv_scaler, has_mask, lk_valid):
    if has_mask:
        q_ref, k_ref, v_ref, mask_ref, out_ref, attn_ref = refs
    else:
        q_ref, k_ref, v_ref, out_ref, attn_ref = refs
        mask_ref = None

    # Fold the 1/sqrt(d_model) scale into the (tq, D) q tile (Lk/D x fewer VPU
    # multiplies than scaling the (tq, Lk) logits).  Weak-typed python float keeps
    # the input dtype, so bf16 inputs still feed the MXU directly.
    q = q_ref[...] * inv_scaler          # (tq, D)
    k = k_ref[...]                       # (Lk_pad, D)
    v = v_ref[...]                       # (Lk_pad, Dv)

    # Logits: contract q's last dim against k's last dim (no explicit transpose).
    s = lax.dot_general(q, k, (((1,), (1,)), ((), ())),
                        preferred_element_type=jnp.float32)    # (tq, Lk_pad) f32

    if lk_valid is not None:
        # Keys beyond the real Lk are wrapper padding: mask them in-kernel (no extra
        # HBM stream) so the softmax normalizer only covers real keys.
        col = lax.broadcasted_iota(jnp.int32, s.shape, 1)
        s = jnp.where(col >= lk_valid, jnp.float32(_NEG_LARGE), s)

    if has_mask:
        # int8 mask tile; nonzero => masked.
        m_f = mask_ref[...].astype(jnp.float32)
        s = jnp.where(m_f != 0.0, jnp.float32(_NEG_LARGE), s)

    # Softmax over keys, all math in f32 (v5e VPU/EUP have no bf16).
    row_max = jnp.max(s, axis=-1, keepdims=True)
    e = jnp.exp(s - row_max)
    denom = jnp.sum(e, axis=-1, keepdims=True)
    p = e * pl.reciprocal(denom, approx=False)

    attn_ref[...] = p.astype(attn_ref.dtype)
    # Feed the second matmul from attn_ref: avoids keeping a separate cast copy of p
    # live alongside the f32 p (lower VMEM scratch / spill pressure).
    out_ref[...] = jnp.dot(attn_ref[...], v,
                           preferred_element_type=jnp.float32).astype(out_ref.dtype)


def scaled_dot_product_attention(q, k, v, attn_mask=None, *, d_model=None,
                                 tq_target=256):
    """Returns (output, attn) matching the PyTorch module's forward (eval mode)."""
    B, Lq, D = q.shape
    Bk, Lk, Dk = k.shape
    Bv, Lkv, Dv = v.shape
    assert D == Dk, f"Dimension -1 of q mismatches with k ({D} != {Dk})"
    assert B == Bk == Bv and Lk == Lkv
    if d_model is None:
        d_model = D
    inv_scaler = 1.0 / math.sqrt(d_model)
    itemsize = jnp.dtype(q.dtype).itemsize
    has_mask = attn_mask is not None

    # ---- pad Lk to a lane-dense multiple of 128 (attn writeback is the dominant
    #      HBM stream; non-128 Lk forces masked partial stores). -------------------
    Lk_pad = _round_up(Lk, 128)
    pad_k = Lk_pad - Lk
    if pad_k:
        k = jnp.pad(k, ((0, 0), (0, pad_k), (0, 0)))
        v = jnp.pad(v, ((0, 0), (0, pad_k), (0, 0)))
    lk_valid = Lk if pad_k else None

    # ---- choose the Lq tile from the VMEM budget (v7x: 64 MiB, v5e/v6e: 128 MiB) --
    vmem_cap = _vmem_capacity_bytes()
    budget = int(0.6 * vmem_cap)
    tq = _select_tq(Lq, Lk_pad, D, Dv, itemsize, has_mask, B, tq_target, budget)
    Lq_pad = _round_up(Lq, tq)
    pad_q = Lq_pad - Lq
    if pad_q:
        q = jnp.pad(q, ((0, 0), (0, pad_q), (0, 0)))
    n_qt = Lq_pad // tq
    grid = (B, n_qt)

    # K/V block index is constant across the inner Lq-tile axis: single-buffer them
    # (Buffered(1)) so they don't cost 2x VMEM for no overlap gain.
    in_specs = [
        pl.BlockSpec((pl.Squeezed(), tq, D), lambda b, i: (b, i, 0)),        # q tile
        pl.BlockSpec((pl.Squeezed(), Lk_pad, D), lambda b, i: (b, 0, 0),
                     pipeline_mode=pl.Buffered(1)),                          # K resident
        pl.BlockSpec((pl.Squeezed(), Lk_pad, Dv), lambda b, i: (b, 0, 0),
                     pipeline_mode=pl.Buffered(1)),                          # V resident
    ]
    inputs = [q, k, v]
    if has_mask:
        assert attn_mask.shape == (B, Lq, Lk), "Attention mask shape mismatch"
        mask = attn_mask.astype(jnp.int8)
        if pad_q or pad_k:
            # Padded rows/cols unmasked here; padded keys are masked in-kernel.
            mask = jnp.pad(mask, ((0, 0), (0, pad_q), (0, pad_k)))
        in_specs.append(pl.BlockSpec((pl.Squeezed(), tq, Lk_pad),
                                     lambda b, i: (b, i, 0)))
        inputs.append(mask)

    out_specs = [
        pl.BlockSpec((pl.Squeezed(), tq, Dv), lambda b, i: (b, i, 0)),       # output
        pl.BlockSpec((pl.Squeezed(), tq, Lk_pad), lambda b, i: (b, i, 0)),   # attn probs
    ]

    # ---- scoped-VMEM limit from the actual estimate (+~30% margin), clamped -------
    est = _estimate_vmem_bytes(tq, Lk_pad, D, Dv, itemsize, has_mask)
    vmem_limit = min(max(int(est * 1.3), 32 * 1024 * 1024), vmem_cap)

    kernel = partial(_sdpa_kernel, inv_scaler=inv_scaler, has_mask=has_mask,
                     lk_valid=lk_valid)

    out, attn = pl.pallas_call(
        kernel,
        out_shape=(
            jax.ShapeDtypeStruct((B, Lq_pad, Dv), q.dtype),
            jax.ShapeDtypeStruct((B, Lq_pad, Lk_pad), q.dtype),
        ),
        grid_spec=pltpu.PrefetchScalarGridSpec(
            num_scalar_prefetch=0,
            grid=grid,
            in_specs=in_specs,
            out_specs=out_specs,
        ),
        compiler_params=pltpu.CompilerParams(
            dimension_semantics=("parallel", "parallel"),
            vmem_limit_bytes=vmem_limit,
        ),
    )(*inputs)

    if pad_q or pad_k:
        out = out[:, :Lq]
        attn = attn[:, :Lq, :Lk]
    return out, attn


def _reference(q, k, v, attn_mask=None):
    d = q.shape[-1]
    s = jnp.einsum("bqd,bkd->bqk", q, k) / math.sqrt(d)
    if attn_mask is not None:
        s = jnp.where(attn_mask != 0, _NEG_LARGE, s)
    p = jax.nn.softmax(s, axis=-1)
    o = jnp.einsum("bqk,bkd->bqd", p, v)
    return o, p


if __name__ == "__main__":
    key = jax.random.PRNGKey(0)
    kq, kk, kv, km = jax.random.split(key, 4)

    B, Lq, Lk, D, Dv = 2, 8, 8, 16, 16  # d_model = 16, scaler = 4.0
    q = jax.random.normal(kq, (B, Lq, D), dtype=jnp.float32)
    k = jax.random.normal(kk, (B, Lk, D), dtype=jnp.float32)
    v = jax.random.normal(kv, (B, Lk, Dv), dtype=jnp.float32)

    # --- no-mask path (no mask tensor is materialized or DMA'd) ---
    out, attn = scaled_dot_product_attention(q, k, v, attn_mask=None, d_model=D)
    jax.block_until_ready((out, attn))
    ref_out, ref_attn = _reference(q, k, v)
    assert out.shape == (B, Lq, Dv) and attn.shape == (B, Lq, Lk)
    assert jnp.allclose(out, ref_out, atol=1e-5, rtol=1e-5)
    assert jnp.allclose(attn, ref_attn, atol=1e-5, rtol=1e-5)

    # --- masked path (int8 mask, no row fully masked) ---
    mask = jax.random.uniform(km, (B, Lq, Lk)) < 0.3
    mask = mask.at[:, :, 0].set(False)  # guarantee at least one unmasked key per row
    out_m, attn_m = scaled_dot_product_attention(q, k, v, attn_mask=mask, d_model=D)
    jax.block_until_ready((out_m, attn_m))
    ref_out_m, ref_attn_m = _reference(q, k, v, mask)
    assert jnp.allclose(out_m, ref_out_m, atol=1e-5, rtol=1e-5)
    assert jnp.allclose(attn_m, ref_attn_m, atol=1e-5, rtol=1e-5)

    print("KERNEL_OK")
</pallas_src>

<mosaic_0001>
module attributes {stable_mosaic.version = 11 : i64} {
  func.func @_sdpa_kernel(%arg0: i32, %arg1: i32, %arg2: memref<1x32x16xf32, #tpu.memory_space<vmem>>, %arg3: memref<1x128x16xf32, #tpu.memory_space<vmem>>, %arg4: memref<1x128x16xf32, #tpu.memory_space<vmem>>, %arg5: memref<1x32x16xf32, #tpu.memory_space<vmem>>, %arg6: memref<1x32x128xf32, #tpu.memory_space<vmem>>) attributes {dimension_semantics = [#tpu.dimension_semantics<parallel>, #tpu.dimension_semantics<parallel>], iteration_bounds = array<i64: 2, 1>, scalar_prefetch = 0 : i64, scratch_operands = 0 : i64, tpu.core_type = #tpu.core_type<tc>, window_params = [{transform_indices = @transform_0, window_bounds = array<i64: 1, 32, 16>}, {pipeline_mode = #tpu.pipeline_mode<synchronous>, transform_indices = @transform_1, window_bounds = array<i64: 1, 128, 16>}, {pipeline_mode = #tpu.pipeline_mode<synchronous>, transform_indices = @transform_2, window_bounds = array<i64: 1, 128, 16>}, {transform_indices = @transform_3, window_bounds = array<i64: 1, 32, 16>}, {transform_indices = @transform_4, window_bounds = array<i64: 1, 32, 128>}]} {
    %c0 = arith.constant 0 : index
    %c0_0 = arith.constant 0 : index
    %c0_1 = arith.constant 0 : index
    %0 = vector.load %arg2[%c0, %c0_0, %c0_1] : memref<1x32x16xf32, #tpu.memory_space<vmem>>, vector<1x32x16xf32>
    %1 = vector.shape_cast %0 : vector<1x32x16xf32> to vector<32x16xf32>
    %cst = arith.constant 2.500000e-01 : f32
    %2 = vector.broadcast %cst : f32 to vector<32x16xf32>
    %3 = arith.mulf %1, %2 : vector<32x16xf32>
    %c0_2 = arith.constant 0 : index
    %c0_3 = arith.constant 0 : index
    %c0_4 = arith.constant 0 : index
    %4 = vector.load %arg3[%c0_2, %c0_3, %c0_4] : memref<1x128x16xf32, #tpu.memory_space<vmem>>, vector<1x128x16xf32>
    %5 = vector.shape_cast %4 : vector<1x128x16xf32> to vector<128x16xf32>
    %c0_5 = arith.constant 0 : index
    %c0_6 = arith.constant 0 : index
    %c0_7 = arith.constant 0 : index
    %6 = vector.load %arg4[%c0_5, %c0_6, %c0_7] : memref<1x128x16xf32, #tpu.memory_space<vmem>>, vector<1x128x16xf32>
    %7 = vector.shape_cast %6 : vector<1x128x16xf32> to vector<128x16xf32>
    %cst_8 = arith.constant dense<0.000000e+00> : vector<32x128xf32>
    %8 = tpu.matmul %3, %5, %cst_8 {dimension_numbers = #tpu.dot_dimension_numbers<[1], [1], [0], [0], [0, 0, 1, 0], [], []>} : vector<32x16xf32>, vector<128x16xf32>, vector<32x128xf32> -> vector<32x128xf32>
    %9 = tpu.iota {dimensions = array<i32: 1>} : vector<32x128xi32>
    %c8_i32 = arith.constant 8 : i32
    %10 = vector.broadcast %c8_i32 : i32 to vector<32x128xi32>
    %11 = arith.cmpi sge, %9, %10 : vector<32x128xi32>
    %cst_9 = arith.constant -1.000000e+30 : f32
    %12 = vector.broadcast %cst_9 : f32 to vector<32x128xf32>
    %13 = arith.select %11, %12, %8 : vector<32x128xi1>, vector<32x128xf32>
    %cst_10 = arith.constant dense<0xFF800000> : vector<32xf32>
    %14 = vector.multi_reduction <maximumf>, %13, %cst_10 [1] : vector<32x128xf32> to vector<32xf32>
    %15 = vector.shape_cast %14 : vector<32xf32> to vector<32x1xf32>
    %16 = vector.broadcast %15 : vector<32x1xf32> to vector<32x128xf32>
    %17 = arith.subf %13, %16 : vector<32x128xf32>
    %18 = math.exp %17 : vector<32x128xf32>
    %cst_11 = arith.constant dense<0.000000e+00> : vector<32xf32>
    %19 = vector.multi_reduction <add>, %18, %cst_11 [1] : vector<32x128xf32> to vector<32xf32>
    %20 = vector.shape_cast %19 : vector<32xf32> to vector<32x1xf32>
    %21 = tpu.reciprocal %20 : vector<32x1xf32> -> vector<32x1xf32>
    %22 = vector.broadcast %21 : vector<32x1xf32> to vector<32x128xf32>
    %23 = arith.mulf %18, %22 : vector<32x128xf32>
    %c0_12 = arith.constant 0 : index
    %c0_13 = arith.constant 0 : index
    %c0_14 = arith.constant 0 : index
    %24 = vector.load %arg6[%c0_12, %c0_13, %c0_14] : memref<1x32x128xf32, #tpu.memory_space<vmem>>, vector<1x32x128xf32>
    %25 = vector.shape_cast %24 : vector<1x32x128xf32> to vector<32x128xf32>
    %26 = vector.shape_cast %23 : vector<32x128xf32> to vector<1x32x128xf32>
    tpu.vector_store %arg6[%c0_12, %c0_13, %c0_14], %26 {strides = array<i32>} : memref<1x32x128xf32, #tpu.memory_space<vmem>>, vector<1x32x128xf32>,
    %c0_15 = arith.constant 0 : index
    %c0_16 = arith.constant 0 : index
    %c0_17 = arith.constant 0 : index
    %27 = vector.load %arg6[%c0_15, %c0_16, %c0_17] : memref<1x32x128xf32, #tpu.memory_space<vmem>>, vector<1x32x128xf32>
    %28 = vector.shape_cast %27 : vector<1x32x128xf32> to vector<32x128xf32>
    %cst_18 = arith.constant dense<0.000000e+00> : vector<32x16xf32>
    %29 = tpu.matmul %28, %7, %cst_18 {dimension_numbers = #tpu.dot_dimension_numbers<[1], [0], [0], [1], [0, 0, 1, 1], [], []>} : vector<32x128xf32>, vector<128x16xf32>, vector<32x16xf32> -> vector<32x16xf32>
    %c0_19 = arith.constant 0 : index
    %c0_20 = arith.constant 0 : index
    %c0_21 = arith.constant 0 : index
    %30 = vector.load %arg5[%c0_19, %c0_20, %c0_21] : memref<1x32x16xf32, #tpu.memory_space<vmem>>, vector<1x32x16xf32>
    %31 = vector.shape_cast %30 : vector<1x32x16xf32> to vector<32x16xf32>
    %32 = vector.shape_cast %29 : vector<32x16xf32> to vector<1x32x16xf32>
    tpu.vector_store %arg5[%c0_19, %c0_20, %c0_21], %32 {strides = array<i32>} : memref<1x32x16xf32, #tpu.memory_space<vmem>>, vector<1x32x16xf32>,
    return
  }
  func.func @transform_0(%arg0: i32, %arg1: i32) -> (i32, i32, i32) {
    %c0_i32 = arith.constant 0 : i32
    %c0_i32_0 = arith.constant 0 : i32
    return %arg0, %arg1, %c0_i32 : i32, i32, i32
  }
  func.func @transform_1(%arg0: i32, %arg1: i32) -> (i32, i32, i32) {
    %c0_i32 = arith.constant 0 : i32
    %c0_i32_0 = arith.constant 0 : i32
    %c0_i32_1 = arith.constant 0 : i32
    return %arg0, %c0_i32, %c0_i32_0 : i32, i32, i32
  }
  func.func @transform_2(%arg0: i32, %arg1: i32) -> (i32, i32, i32) {
    %c0_i32 = arith.constant 0 : i32
    %c0_i32_0 = arith.constant 0 : i32
    %c0_i32_1 = arith.constant 0 : i32
    return %arg0, %c0_i32, %c0_i32_0 : i32, i32, i32
  }
  func.func @transform_3(%arg0: i32, %arg1: i32) -> (i32, i32, i32) {
    %c0_i32 = arith.constant 0 : i32
    %c0_i32_0 = arith.constant 0 : i32
    return %arg0, %arg1, %c0_i32 : i32, i32, i32
  }
  func.func @transform_4(%arg0: i32, %arg1: i32) -> (i32, i32, i32) {
    %c0_i32 = arith.constant 0 : i32
    %c0_i32_0 = arith.constant 0 : i32
    return %arg0, %arg1, %c0_i32 : i32, i32, i32
  }
}

</mosaic_0001>

<bundles_post_ra>
// kernel: tpu_custom_call.1
= control target key start
LH: loop header
LB: loop body
LE: loop exit
PB: predicated region body
PF: predicated region fallthrough
CT: control target
= control target key end

     0   :  { %10 = vsyncpa [#allocation3], 0  ;;  %s1437_s0 = inlined_call_operand.vmem [shape: f32[2,32,16], index: 0, kind: input, shape index: {}]   ;;  %s1438_s1 = inlined_call_operand.vmem [shape: f32[2,128,16], index: 1, kind: input, shape index: {}]   ;;  %s1439_s2 = inlined_call_operand.vmem [shape: f32[2,128,16], index: 2, kind: input, shape index: {}]   ;;  %s1440_s3 = inlined_call_operand.vmem [shape: f32[2,32,16], index: 3, kind: output, shape index: {0}]   ;;  %s1441_s4 = inlined_call_operand.hbm [shape: f32[2,32,128], index: 4, kind: output, shape index: {1}]  }
   0x1   :  { %12 = vsyncpa [#allocation3 + $0x1], 0  ;;  %s1213_s15 = smov 0   ;;  %s1215_s16 = smov 0  }
   0x2   :  { %s1217_s17 = smov 0   ;;  %s1219_s18 = smov 0  }
   0x3   :  { %s1221_s19 = smov 0   ;;  %s1223_s20 = smov 0  }
   0x4 LB: > { %s792_s21 = sadd.s32 4294967295, %s1183_s20   ;;  %s793_s22 = sadd.s32 4294967294, %s1183_s20   ;;  %s1183_s20 = sphi %s1223_s20, %s18_s20   ;;  %s1179_s19 = sphi %s1221_s19, %s1450_s19   ;;  %s1175_s18 = sphi %s1219_s18, %s1449_s18   ;;  %s1171_s17 = sphi %s1217_s17, %s1448_s17   ;;  %s1167_s16 = sphi %s1215_s16, %s1447_s16   ;;  %s1163_s15 = sphi %s1213_s15, %s1446_s15  }
   0x5   : > { %s30_s23 = sadd.s32 1, %s1179_s19  ;;  %s147_s24 = sadd.s32 1, %s1171_s17 }
   0x6   : > { %p32_p0 = scmp.ge.s32.totalorder %s30_s23, 2  ;;  %p157_p1 = scmp.ne.s32.totalorder %s1171_s17, %s1167_s16 }
   0x7   : > { %p158_p2 = scmp.eq.s32.totalorder %s792_s21, 1  ;;  %p163_p3 = scmp.ne.s32.totalorder %s1167_s16, %s1163_s15 }
   0x8   : > { %s1452_s23 = smov (%p32_p0, %s30_s23), 0  ;;  %p164_p5 = scmp.eq.s32.totalorder %s793_s22, 1 }
   0x9   : > { %p1253_p4 = por %p158_p2, %p157_p1  ;;  %s142_s26 = ssub.s32 %s1179_s19, %s1452_s23 }
   0xa   : > { %p796_p6 = scmp.ge.s32.totalorder %s1183_s20, 1  ;;  %p145_p7 = scmp.eq.s32.totalorder %s142_s26, 0 }
   0xb   : > { %p1260_p8 = por %p164_p5, %p163_p3  ;;  %p211_p9 = scmp.lt.s32.totalorder %s1183_s20, 3 }
   0xc   : > { %s1266_s28 = scalar_select %p145_p7, %s1171_s17, %s147_s24  }
   0xd   : > { %p212_p10 = pnand %p796_p6, %p211_p9 }
   0xe   : > { %p261_p11 = scmp.lt.s32.totalorder (!%p212_p10), %s1175_s18, 1  ;;  %vm331_vm0 = vcmask (!%p212_p10), 130048   ;;  %v477_v33 = vlaneseq (!%p212_p10)  ;;  %s257_s21 = sand.u32 (!%p212_p10), 1, %s1167_s16  }
   0xf   : > { %215 = sbr.rel (%p212_p10) target bundleno = 841 (0x349), region = 32  ;;  %vm1282_vm1 = vmpackc.low (!%p212_p10), %vm331_vm0, %vm331_vm0  ;;  %s797_s22 = sshll.u32 (!%p212_p10), %s257_s21, 5 }
  0x10   : > { %v478_v34 = vand.u32 (!%p212_p10), 127, %v477_v33  ;;  %s259_s24 = scalar_lea.vmem (!%p212_p10), [#allocation2], %s797_s22  ;;  %s835_s26 = sshll.u32 (!%p212_p10), %s1175_s18, 9 }
  0x11   : > { %s1382_s9 = scalar_lea.sflag (!%p212_p10), [#allocation3], %s257_s21 }
  0x12   : > { %vm479_vm2 = vcmp.ge.s32.totalorder (!%p212_p10), %v478_v34, 8 }
  0x16   : > { %s1270_s29 = scalar_select %p261_p11, %s1175_s18, 1 }
  0x18   : > { %s832_s30 = sshll.u32 %s1270_s29, 7  ;;  %s831_s8 = sshll.u32 %s1270_s29, 5 }
  0x19   : > { %s1278_s7 = scalar_lea.vmem %s1438_s1, %s832_s30  ;;  %s1296_s11 = scalar_lea.vmem %s1437_s0, %s831_s8 }
  0x1a   : > { %v299_v1 = vld [vmem:[%s1278_s7] sm:$0xff]  ;;  %v300_v2 = vld [vmem:[%s1278_s7 + $0x8] sm:$0xff]  ;;  %v301_v3 = vld [vmem:[%s1278_s7 + $0x10] sm:$0xff]  ;;  %s1355_s14 = scalar_lea.vmem %s1439_s2, %s832_s30  ;;  %s646_s30 = sshll.u32 %s259_s24, 4  ;;  %s1380_s30 = int_to_ptr.vmem [resolvable:$true] %s646_s30 }
  0x1b   : > { %v952_v4 = vpack.c.bf16 %v300_v2, %v299_v1  ;;  %v302_v5 = vld [vmem:[%s1278_s7 + $0x18] sm:$0xff]  ;;  %v291_v7 = vld [vmem:[%s1296_s11] sm:$0xff]  ;;  %v304_v9 = vld [vmem:[%s1278_s7 + $0x28] sm:$0xff]  ;;  %s1105_s10 = scalar_lea.vmem %s1380_s30, 512 }
  0x1c   : > { %v958_v6 = vpack.c.bf16 %v302_v5, %v301_v3  ;;  %v303_v8 = vld [vmem:[%s1278_s7 + $0x20] sm:$0xff]  ;;  %v295_v10 = vmul.f32 0.25, %v291_v7  ;;  %v305_v12 = vld [vmem:[%s1278_s7 + $0x30] sm:$0xff]  ;;  %v306_v13 = vld [vmem:[%s1278_s7 + $0x38] sm:$0xff]  ;;  %p1106_p12 = scmp.ne.s32.totalorder %s1380_s30, %s1105_s10 }
  0x1d   : > { %954 = vmatprep.subr.msk.bf16.mxu0 %vm1282_vm1, %v952_v4  ;;  %v964_v11 = vpack.c.bf16 %v304_v9, %v303_v8  ;;  %v970_v14 = vpack.c.bf16 %v306_v13, %v305_v12  ;;  %v307_v15 = vld [vmem:[%s1278_s7 + $0x40] sm:$0xff]  ;;  %v308_v16 = vld [vmem:[%s1278_s7 + $0x48] sm:$0xff]  ;;  %v309_v18 = vld [vmem:[%s1278_s7 + $0x50] sm:$0xff] }
  0x1e   : > { %957 = vmatpush3.bf16.xpose.msk.msra.mxu0 %vm1282_vm1, %v952_v4  ;;  %908 = vmatprep.mubr.msk.f32.mxu0 %vm331_vm0, %v295_v10  ;;  %v976_v17 = vpack.c.bf16 %v308_v16, %v307_v15  ;;  %v310_v19 = vld [vmem:[%s1278_s7 + $0x58] sm:$0xff]  ;;  %v311_v21 = vld [vmem:[%s1278_s7 + $0x60] sm:$0xff]  ;;  %v312_v22 = vld [vmem:[%s1278_s7 + $0x68] sm:$0xff]  ;;  %p1107_p13 = pnand %p1106_p12, %p1253_p4 }
  0x1f   : > { %960 = vmatprep.subr.msk.bf16.mxu0 %vm1282_vm1, %v958_v6  ;;  %v982_v20 = vpack.c.bf16 %v310_v19, %v309_v18  ;;  %v988_v23 = vpack.c.bf16 %v312_v22, %v311_v21  ;;  %v313_v24 = vld [vmem:[%s1278_s7 + $0x70] sm:$0xff]  ;;  %v314_v25 = vld [vmem:[%s1278_s7 + $0x78] sm:$0xff]  ;;  %v292_v27 = vld [vmem:[%s1296_s11 + $0x8] sm:$0xff]  ;;  %s1378_s7 = scalar_lea.hbm %s1441_s4, %s835_s26 }
  0x20   : > { %v994_v26 = vpack.c.bf16 %v314_v25, %v313_v24  ;;  %v293_v28 = vld [vmem:[%s1296_s11 + $0x10] sm:$0xff]  ;;  %v296_v29 = vmul.f32 0.25, %v292_v27  ;;  %v294_v31 = vld [vmem:[%s1296_s11 + $0x18] sm:$0xff]  ;;  %v315_v43 = vld [vmem:[%s1355_s14] sm:$0xff]  ;;  %p1108_p0 = pneg %p1107_p13  ;;  %s1185_s11 = smov [#allocation2]  }
  0x21   : > { %v297_v30 = vmul.f32 0.25, %v293_v28  ;;  %v298_v32 = vmul.f32 0.25, %v294_v31  ;;  %v316_v44 = vld [vmem:[%s1355_s14 + $0x8] sm:$0xff]  ;;  %v317_v45 = vld [vmem:[%s1355_s14 + $0x10] sm:$0xff]  ;;  %v318_v47 = vld [vmem:[%s1355_s14 + $0x18] sm:$0xff]  ;;  %s1109_s18 = sshll.u32 %s1185_s11, 4  ;;  %s1110_s18 = int_to_ptr.vmem [resolvable:$false] %s1109_s18 }
  0x22   : > { %v1000_v46 = vpack.c.bf16 %v316_v44, %v315_v43  ;;  %v1004_v48 = vpack.c.bf16 %v318_v47, %v317_v45  ;;  %v319_v0 = vld [vmem:[%s1355_s14 + $0x20] sm:$0xff]  ;;  %v320_v1 = vld [vmem:[%s1355_s14 + $0x28] sm:$0xff]  ;;  %v321_v4 = vld [vmem:[%s1355_s14 + $0x30] sm:$0xff]  ;;  %s1111_s12 = scalar_lea.vmem %s1110_s18, 1024  ;;  %p1112_p1 = scmp.lt.s32.totalorder %s1380_s30, %s1110_s18 }
  0x23   : > { %v1008_v2 = vpack.c.bf16 %v320_v1, %v319_v0  ;;  %v322_v5 = vld [vmem:[%s1355_s14 + $0x38] sm:$0xff]  ;;  %v323_v7 = vld [vmem:[%s1355_s14 + $0x40] sm:$0xff]  ;;  %v324_v8 = vld [vmem:[%s1355_s14 + $0x48] sm:$0xff]  ;;  %p1113_p2 = scmp.lt.s32.totalorder %s1111_s12, %s1105_s10 }
  0x24   : > { %1001 = vmatprep.subr.bf16.mxu1 %v1000_v46  ;;  %v1016_v9 = vpack.c.bf16 %v324_v8, %v323_v7  ;;  %v325_v10 = vld [vmem:[%s1355_s14 + $0x50] sm:$0xff]  ;;  %v327_v13 = vld [vmem:[%s1355_s14 + $0x60] sm:$0xff] }
  0x25   : > { %1003 = vmatpush3.bf16.msra.mxu1 %v1000_v46  ;;  %v329_v16 = vld [vmem:[%s1355_s14 + $0x70] sm:$0xff]  ;;  %p1114_p3 = por %p1113_p2, %p1112_p1 }
  0x26   : > { %963 = vmatpush3.bf16.xpose.msk.msra.mxu0 %vm1282_vm1, %v958_v6  ;;  %1005 = vmatprep.subr.bf16.mxu1 %v1004_v48  ;;  %v1012_v6 = vpack.c.bf16 %v322_v5, %v321_v4 }
  0x27   : > { %966 = vmatprep.subr.msk.bf16.mxu0 %vm1282_vm1, %v964_v11  ;;  %p1115_p5 = pnand %p1114_p3, %p1108_p0 }
  0x29   : > { %1007 = vmatpush3.bf16.msra.mxu1 %v1004_v48 }
  0x2a   : > { %1009 = vmatprep.subr.bf16.mxu1 %v1008_v2 }
  0x2d   : > { %1011 = vmatpush3.bf16.msra.mxu1 %v1008_v2 }
  0x2e   : > { %969 = vmatpush3.bf16.xpose.msk.msra.mxu0 %vm1282_vm1, %v964_v11  ;;  %1013 = vmatprep.subr.bf16.mxu1 %v1012_v6  ;;  %v326_v11 = vld [vmem:[%s1355_s14 + $0x58] sm:$0xff] }
  0x2f   : > { %972 = vmatprep.subr.msk.bf16.mxu0 %vm1282_vm1, %v970_v14  ;;  %v1020_v12 = vpack.c.bf16 %v326_v11, %v325_v10 }
  0x31   : > { %1015 = vmatpush3.bf16.msra.mxu1 %v1012_v6 }
  0x32   : > { %1017 = vmatprep.subr.bf16.mxu1 %v1016_v9 }
  0x35   : > { %1019 = vmatpush3.bf16.msra.mxu1 %v1016_v9 }
  0x36   : > { %975 = vmatpush3.bf16.xpose.msk.msra.mxu0 %vm1282_vm1, %v970_v14  ;;  %1021 = vmatprep.subr.bf16.mxu1 %v1020_v12  ;;  %v328_v14 = vld [vmem:[%s1355_s14 + $0x68] sm:$0xff] }
  0x37   : > { %978 = vmatprep.subr.msk.bf16.mxu0 %vm1282_vm1, %v976_v17  ;;  %v1024_v15 = vpack.c.bf16 %v328_v14, %v327_v13 }
  0x39   : > { %1023 = vmatpush3.bf16.msra.mxu1 %v1020_v12 }
  0x3a   : > { %1025 = vmatprep.subr.bf16.mxu1 %v1024_v15 }
  0x3d   : > { %1027 = vmatpush3.bf16.msra.mxu1 %v1024_v15 }
  0x3e   : > { %981 = vmatpush3.bf16.xpose.msk.msra.mxu0 %vm1282_vm1, %v976_v17  ;;  %v330_v17 = vld [vmem:[%s1355_s14 + $0x78] sm:$0xff] }
  0x3f   : > { %984 = vmatprep.subr.msk.bf16.mxu0 %vm1282_vm1, %v982_v20  ;;  %v1028_v18 = vpack.c.bf16 %v330_v17, %v329_v16 }
  0x41   : > { %1029 = vmatprep.subr.bf16.mxu1 %v1028_v18 }
  0x42   : > { %1031 = vmatpush3.bf16.msra.mxu1 %v1028_v18 }
  0x46   : > { %987 = vmatpush3.bf16.xpose.msk.msra.mxu0 %vm1282_vm1, %v982_v20 }
  0x47   : > { %990 = vmatprep.subr.msk.bf16.mxu0 %vm1282_vm1, %v988_v23 }
  0x4e   : > { %993 = vmatpush3.bf16.xpose.msk.msra.mxu0 %vm1282_vm1, %v988_v23 }
  0x4f   : > { %996 = vmatprep.subr.msk.bf16.mxu0 %vm1282_vm1, %v994_v26 }
  0x56   : > { %999 = vmatpush3.bf16.xpose.msk.msra.mxu0 %vm1282_vm1, %v994_v26 }
  0x5d   : > { %909 = vmatmul.mubr.msk.f32.vlgmr.msra.gmra.mrb[0].mxu0 %vm331_vm0, %v296_v29 }
  0x5e   : > { %911 = vmatprep.mubr.msk.f32.mxu0 %vm331_vm0, %v297_v30 }
  0x61   : > { %912 = vmatmul.mubr.msk.f32.gmra.mrb[2].mxu0 %vm331_vm0, %v298_v32 }
 0x130   : > { %v910_v35 = vpop.f32.mrb[0].mxu0 }
 0x131   : > { %v458_v36 = vpop.f32.mrb[1].mxu0  ;;  %v481_v40 = vsel %vm479_vm2, -1e+30, %v910_v35 }
 0x132   : > { %v480_v37 = vsel %vm479_vm2, -1e+30, %v458_v36 }
 0x133   : > { %484 = vmax.xlane.f32.xlu0 %v480_v37 }
 0x134   : > { %v913_v38 = vpop.f32.mrb[2].mxu0 }
 0x135   : > { %v468_v39 = vpop.f32.mrb[3].mxu0  ;;  %v483_v42 = vsel %vm479_vm2, -1e+30, %v913_v38 }
 0x136   : > { %v482_v41 = vsel %vm479_vm2, -1e+30, %v468_v39 }
 0x137   : > { %486 = vmax.xlane.f32.xlu0 %v481_v40  ;;  %488 = vmax.xlane.f32.xlu1 %v482_v41 }
 0x13b   : > { %490 = vmax.xlane.f32.xlu1 %v483_v42 }
 0x1c0   : > { %v485_v49 = vpop.xlane.xlu0 %484 }
 0x1c1   : > { %v492_v50 = vsub.f32 %v480_v37, %v485_v49 }
 0x1c3   : > { %v496_v51 = vmul.f32 1.442695, %v492_v50 }
 0x1c4   : > { %v487_v52 = vpop.xlane.xlu0 %486  ;;  %v489_v53 = vpop.xlane.xlu1 %488 }
 0x1c5   : > { %1089 = vpow2.f32 %v496_v51  ;;  %v493_v54 = vsub.f32 %v481_v40, %v487_v52  ;;  %v494_v55 = vsub.f32 %v482_v41, %v489_v53 }
 0x1c7   : > { %v498_v56 = vmul.f32 1.442695, %v493_v54  ;;  %v500_v57 = vmul.f32 1.442695, %v494_v55 }
 0x1c8   : > { %v491_v58 = vpop.xlane.xlu1 %490 }
 0x1c9   : > { %1091 = vpow2.f32 %v498_v56  ;;  %v495_v59 = vsub.f32 %v483_v42, %v491_v58 }
 0x1ca   : > { %1093 = vpow2.f32 %v500_v57 }
 0x1cb   : > { %v502_v60 = vmul.f32 1.442695, %v495_v59 }
 0x1cd   : > { %1095 = vpow2.f32 %v502_v60 }
 0x1cf   : > { %v1090_v61 = vpop.eup %1089 }
 0x1d0   : > { %504 = vadd.xlane.f32.xlu0 %v1090_v61 }
 0x1d3   : > { %v1092_v62 = vpop.eup %1091 }
 0x1d4   : > { %v1094_v63 = vpop.eup %1093  ;;  %506 = vadd.xlane.f32.xlu1 %v1092_v62 }
 0x1d5   : > { %508 = vadd.xlane.f32.xlu0 %v1094_v63 }
 0x1d7   : > { %v1096_v3 = vpop.eup %1095 }
 0x1d8   : > { %510 = vadd.xlane.f32.xlu1 %v1096_v3 }
 0x25d   : > { %v505_v19 = vpop.xlane.xlu0 %504 }
 0x25e   : > { %1097 = vrcp.f32 %v505_v19 }
 0x261   : > { %v507_v20 = vpop.xlane.xlu1 %506 }
 0x262   : > { %v509_v21 = vpop.xlane.xlu0 %508  ;;  %1099 = vrcp.f32 %v507_v20 }
 0x263   : > { %1101 = vrcp.f32 %v509_v21 }
 0x265   : > { %v511_v22 = vpop.xlane.xlu1 %510 }
 0x266   : > { %1103 = vrcp.f32 %v511_v22 }
 0x268   : > { %v1098_v23 = vpop.eup %1097 }
 0x269   : > { %v516_v24 = vmul.f32 %v1098_v23, %v1090_v61 }
 0x26b   : > { %520 = vst [vmem:[%s259_s24] sm:$0xff] %v516_v24  ;;  %946 = vmatprep.mubr.f32.mxu1 %v516_v24 }
 0x26c   : > { %v1100_v25 = vpop.eup %1099 }
 0x26d   : > { %v1102_v26 = vpop.eup %1101  ;;  %v517_v27 = vmul.f32 %v1100_v25, %v1092_v62 }
 0x26e   : > { %v518_v28 = vmul.f32 %v1102_v26, %v1094_v63 }
 0x26f   : > { %521 = vst [vmem:[%s259_s24 + $0x8] sm:$0xff] %v517_v27  ;;  %947 = vmatmul.mubr.f32.vlgmr.msra.gmra.mrb[0].mxu1 %v517_v27 }
 0x270   : > { %v1104_v29 = vpop.eup %1103  ;;  %522 = vst [vmem:[%s259_s24 + $0x10] sm:$0xff] %v518_v28  ;;  %949 = vmatprep.mubr.f32.mxu1 %v518_v28 }
 0x271   : > { %v519_v30 = vmul.f32 %v1104_v29, %v1096_v3 }
 0x273   : > { %523 = vst [vmem:[%s259_s24 + $0x18] sm:$0xff] %v519_v30  ;;  %950 = vmatmul.mubr.f32.gmra.mrb[2].mxu1 %v519_v30 }
 0x274   : > { %1118 = shalt.err (!%p1115_p5)
}
 0x275   : > { %s1119_s13 = scalar_lea.hbm %s1378_s7, 512  ;;  %s1123_s22 = scalar_lea.hbm %s1441_s4, 1024 }
 0x276   : > { %p1120_p6 = scmp.ne.s32.totalorder %s1378_s7, %s1119_s13  ;;  %p1124_p10 = scmp.lt.u32.totalorder %s1378_s7, %s1441_s4 }
 0x277   : > { %p1125_p11 = scmp.lt.u32.totalorder %s1123_s22, %s1119_s13  ;;  %p1127_p13 = scmp.lt.u32.totalorder %s1119_s13, %s1378_s7 }
 0x278   : > { %p1121_p7 = pnand %p1120_p6, %p1253_p4 }
 0x279   : > { %p1126_p12 = por %p1125_p11, %p1124_p10 }
 0x27a   : > { %p1122_p9 = pneg %p1121_p7 }
 0x27b   : > { %p1128_p0 = por %p1127_p13, %p1126_p12 }
 0x27d   : > { %p1129_p1 = pnand %p1128_p0, %p1122_p9 }
 0x27f   : > { %1132 = shalt.err (!%p1129_p1)
}
 0x280   : > { %s1186_s5 = smov 128   ;;  %s1187_s6 = smov 8  }
 0x281   : > { %1032 = dma.vmem_to_hbm [thread:$0]  (%p1253_p4), %s1380_s30, 512, %s1378_s7, %s1382_s9, %s1186_s5, %s1186_s5, %s1187_s6  }
 0x282   : > { %s288_s18 = scalar_lea.vmem %s1440_s3, %s831_s8 }
 0x342   : > { %v948_v31 = vpop.f32.mrb[0].mxu1 }
 0x343   : > { %614 = vst.msk [vmem:[%s288_s18 + $0x8] sm:$0xff] %vm331_vm0, %v948_v31  ;;  %v594_v32 = vpop.f32.mrb[1].mxu1 }
 0x344   : > { %613 = vst.msk [vmem:[%s288_s18] sm:$0xff] %vm331_vm0, %v594_v32 }
 0x346   : > { %v951_v33 = vpop.f32.mrb[2].mxu1 }
 0x347   : > { %616 = vst.msk [vmem:[%s288_s18 + $0x18] sm:$0xff] %vm331_vm0, %v951_v33  ;;  %v604_v34 = vpop.f32.mrb[3].mxu1 }
 0x348   : > { %615 = vst.msk [vmem:[%s288_s18 + $0x10] sm:$0xff] %vm331_vm0, %v604_v34 }
 0x349 PF: > { %p1038_p4 = scmp.ge.s32.totalorder %s1183_s20, 2  ;;  %s673_s25 = sand.u32 1, %s1163_s15  }
 0x34a   : > { %s674_s29 = scalar_lea.sflag [#allocation3], %s673_s25 }
 0x34b   : > { %p1035_p2 = pnand %p1038_p4, %p1260_p8 }
 0x34d   : > { %1158 = dma.done.wait (!%p1035_p2), %s674_s29, 512  }
 0x34e   : > { %1160 = vsyncadd (!%p1035_p2), %s674_s29, 4294966784  ;;  %s18_s20 = sadd.s32 1, %s1183_s20   ;;  %s1446_s15 = smov %s1167_s16 }
 0x34f   : > { %p15_p3 = scmp.ge.s32.totalorder %s18_s20, 4   ;;  %s1447_s16 = smov %s1171_s17 }
 0x350   : > { %s1448_s17 = smov %s1266_s28  ;;  %s1449_s18 = smov %s1179_s19 }
 0x351   : > { %s1450_s19 = smov %s1452_s23  ;;  %17 = sbr.rel (!%p15_p3) target bundleno = 4 (0x4), region = 85 }
 0x358   :  { %679 = vsyncpa [#allocation3], 1 }
 0x359   :  { %681 = vsyncpa [#allocation3 + $0x1], 1 }

</bundles_post_ra>
